<compile_context>
chip_gen: v6e
topology: v6e:2x2x1
jax: 0.10.0
libtpu: 0.0.40
codegen_flags: <defaults>
</compile_context>

<pallas_src>
import jax
import jax.numpy as jnp
from jax.experimental import pallas as pl
from jax.experimental.pallas import tpu as pltpu


def _round_up(n, m):
    return ((n + m - 1) // m) * m


# ---------------------------------------------------------------------------
# Kernels
# ---------------------------------------------------------------------------
def _linear_kernel_single_k(x_ref, wt_ref, b_ref, o_ref):
    # Whole feature dim in one tile: o = x @ W^T + b in a single MXU pass.
    # x_ref: (TM, K)   wt_ref: (K, TN)   b_ref: (1, TN)   o_ref: (TM, TN)
    o_ref[...] = (
        jnp.dot(x_ref[...], wt_ref[...], preferred_element_type=jnp.float32)
        + b_ref[...]
    ).astype(o_ref.dtype)


def _linear_kernel_multi_k(x_ref, wt_ref, b_ref, o_ref, acc_ref):
    # Fallback for very large K: f32 accumulator resident across the K axis.
    k = pl.program_id(2)

    @pl.when(k == 0)
    def _():
        # Fold the bias into the accumulator init (no extra epilogue add).
        acc_ref[...] = jnp.broadcast_to(b_ref[...], acc_ref.shape)

    acc_ref[...] += jnp.dot(
        x_ref[...], wt_ref[...], preferred_element_type=jnp.float32)

    @pl.when(k == pl.num_programs(2) - 1)
    def _():
        o_ref[...] = acc_ref[...].astype(o_ref.dtype)


# ---------------------------------------------------------------------------
# Wrapper (parameter prep hoisted out of the per-call path)
# ---------------------------------------------------------------------------
class PallasLogisticRegression:
    """y = x @ W^T + b with W, b transposed/padded/cast once at load time."""

    def __init__(self, weight, bias, *, tm=512, tn=256, tk=1024,
                 compute_dtype=jnp.bfloat16):
        C, D = weight.shape
        assert bias.shape == (C,)
        self._C, self._D = C, D
        self._tm_max = tm
        self._compute_dtype = jnp.dtype(compute_dtype)

        # Class (lane) dim: pad to a multiple of 128 -> unmasked stores.
        self._tn = min(tn, _round_up(C, 128))
        Cp = _round_up(C, self._tn)

        # K tiling: collapse the K grid axis when the padded feature dim fits
        # a single tile (typical for logistic regression); otherwise use the
        # multi-K reduction path with an f32 accumulator.
        d_aligned = _round_up(D, 128)
        single_k_max = 4096 if self._compute_dtype.itemsize <= 2 else 2048
        self._multi_k = d_aligned > single_k_max
        if self._multi_k:
            self._tk = min(tk, d_aligned)
            Dp = _round_up(D, self._tk)
        else:
            self._tk = d_aligned
            Dp = d_aligned
        self._Cp, self._Dp = Cp, Dp

        # One-time parameter prep (model-load time, NOT in the jitted forward):
        # transpose (C, D) -> (D, C), zero-pad to (Dp, Cp), cast operand dtype.
        self._wt = jnp.pad(
            weight.T.astype(self._compute_dtype), ((0, Dp - D), (0, Cp - C)))
        self._b = jnp.pad(
            bias.astype(jnp.float32).reshape(1, C), ((0, 0), (0, Cp - C)))

        self._forward = jax.jit(self._forward_impl)

    def __call__(self, x):
        return self._forward(x, self._wt, self._b)

    def _forward_impl(self, x, wt_p, b_p):
        B, D = x.shape
        assert D == self._D, "feature dim mismatch"
        C, Cp, Dp = self._C, self._Cp, self._Dp
        tn, tk = self._tn, self._tk
        out_dtype = x.dtype

        # Batch tiling: minimal padding for small batches; for large batches
        # cap tm so there are >= 2 "parallel" batch tiles (v7x megacore).
        b_aligned = _round_up(B, 8)
        if b_aligned <= self._tm_max:
            tm = b_aligned
        else:
            tm = min(self._tm_max, _round_up((b_aligned + 1) // 2, 8))
        Bp = _round_up(B, tm)

        # Per-call x prep: pad + cast in one fused XLA op (weights already done).
        x_p = x
        if x.dtype != self._compute_dtype or Bp != B or Dp != D:
            x_p = jnp.pad(x.astype(self._compute_dtype),
                          ((0, Bp - B), (0, Dp - D)))

        cd = self._compute_dtype.itemsize
        od = jnp.dtype(out_dtype).itemsize

        if not self._multi_k:
            grid = (Bp // tm, Cp // tn)
            in_specs = [
                pl.BlockSpec((tm, Dp), lambda i, j: (i, 0)),   # x tile
                pl.BlockSpec((Dp, tn), lambda i, j: (0, j)),   # W^T tile
                pl.BlockSpec((1, tn), lambda i, j: (0, j)),    # bias tile
            ]
            out_specs = pl.BlockSpec((tm, tn), lambda i, j: (i, j))
            scratch_shapes = []
            kernel = _linear_kernel_single_k
            sems = ("parallel", "parallel")
            tk_eff = Dp
        else:
            grid = (Bp // tm, Cp // tn, Dp // tk)
            in_specs = [
                pl.BlockSpec((tm, tk), lambda i, j, k: (i, k)),
                pl.BlockSpec((tk, tn), lambda i, j, k: (k, j)),
                pl.BlockSpec((1, tn), lambda i, j, k: (0, j)),
            ]
            out_specs = pl.BlockSpec((tm, tn), lambda i, j, k: (i, j))
            scratch_shapes = [pltpu.VMEM((tm, tn), jnp.float32)]
            kernel = _linear_kernel_multi_k
            sems = ("parallel", "parallel", "arbitrary")
            tk_eff = tk

        # Estimated double-buffered VMEM footprint; only raise the scoped
        # limit when it would exceed v5e's conservative 16 MiB default.
        vmem_bytes = (2 * (tm * tk_eff * cd + tk_eff * tn * cd + tn * 4)
                      + 2 * tm * tn * od)
        if self._multi_k:
            vmem_bytes += tm * tn * 4
        ckw = {"dimension_semantics": sems}
        if vmem_bytes > 12 * (1 << 20):
            ckw["vmem_limit_bytes"] = int(min(vmem_bytes * 3 // 2, 62 << 20))

        out_p = pl.pallas_call(
            kernel,
            out_shape=jax.ShapeDtypeStruct((Bp, Cp), out_dtype),
            grid=grid,
            in_specs=in_specs,
            out_specs=out_specs,
            scratch_shapes=scratch_shapes,
            compiler_params=pltpu.CompilerParams(**ckw),
        )(x_p, wt_p, b_p)

        return out_p[:B, :C]


if __name__ == "__main__":
    # Small shapes consistent with the module: batch=8, input_dim=32, classes=8
    batch, input_dim, num_classes = 8, 32, 8

    key = jax.random.PRNGKey(0)
    kx, kw, kb = jax.random.split(key, 3)

    x = jax.random.normal(kx, (batch, input_dim), dtype=jnp.float32)
    bound = 1.0 / (input_dim ** 0.5)
    weight = jax.random.uniform(kw, (num_classes, input_dim),
                                minval=-bound, maxval=bound, dtype=jnp.float32)
    bias = jax.random.uniform(kb, (num_classes,),
                              minval=-bound, maxval=bound, dtype=jnp.float32)

    ref = x @ weight.T + bias

    # Production config: bf16 operands, f32 accumulation (single-K fast path).
    model = PallasLogisticRegression(weight, bias, compute_dtype=jnp.bfloat16)
    out = jax.block_until_ready(model(x))
    assert out.shape == (batch, num_classes)
    assert out.dtype == x.dtype
    assert jnp.allclose(out, ref, atol=2e-2, rtol=2e-2), (
        f"bf16 max abs err {float(jnp.max(jnp.abs(out - ref)))}")

    # Bit-careful config: f32 operands, tight tolerance (same fast path).
    model_f32 = PallasLogisticRegression(weight, bias, compute_dtype=jnp.float32)
    out_f32 = jax.block_until_ready(model_f32(x))
    assert jnp.allclose(out_f32, ref, atol=1e-5, rtol=1e-5)

    # Multi-K fallback path (feature dim larger than one K tile), f32 exact.
    big_d = 2176
    kw2, kb2, kx2 = jax.random.split(jax.random.PRNGKey(1), 3)
    x2 = jax.random.normal(kx2, (batch, big_d), dtype=jnp.float32)
    bound2 = 1.0 / (big_d ** 0.5)
    w2 = jax.random.uniform(kw2, (num_classes, big_d),
                            minval=-bound2, maxval=bound2, dtype=jnp.float32)
    b2 = jax.random.uniform(kb2, (num_classes,),
                            minval=-bound2, maxval=bound2, dtype=jnp.float32)
    model2 = PallasLogisticRegression(w2, b2, compute_dtype=jnp.float32)
    out2 = jax.block_until_ready(model2(x2))
    ref2 = x2 @ w2.T + b2
    assert jnp.allclose(out2, ref2, atol=1e-4, rtol=1e-4)

    print("KERNEL_OK")
</pallas_src>

<mosaic_0001>
module attributes {stable_mosaic.version = 11 : i64} {
  func.func @_linear_kernel_single_k(%arg0: i32, %arg1: i32, %arg2: memref<8x128xbf16, #tpu.memory_space<vmem>>, %arg3: memref<128x128xbf16, #tpu.memory_space<vmem>>, %arg4: memref<1x128xf32, #tpu.memory_space<vmem>>, %arg5: memref<8x128xf32, #tpu.memory_space<vmem>>) attributes {dimension_semantics = [#tpu.dimension_semantics<parallel>, #tpu.dimension_semantics<parallel>], iteration_bounds = array<i64: 1, 1>, scalar_prefetch = 0 : i64, scratch_operands = 0 : i64, tpu.core_type = #tpu.core_type<tc>, window_params = [{transform_indices = @transform_0, window_bounds = array<i64: 8, 128>}, {transform_indices = @transform_1, window_bounds = array<i64: 128, 128>}, {transform_indices = @transform_2, window_bounds = array<i64: 1, 128>}, {transform_indices = @transform_3, window_bounds = array<i64: 8, 128>}]} {
    %c0 = arith.constant 0 : index
    %c0_0 = arith.constant 0 : index
    %0 = vector.load %arg2[%c0, %c0_0] : memref<8x128xbf16, #tpu.memory_space<vmem>>, vector<8x128xbf16>
    %c0_1 = arith.constant 0 : index
    %c0_2 = arith.constant 0 : index
    %1 = vector.load %arg3[%c0_1, %c0_2] : memref<128x128xbf16, #tpu.memory_space<vmem>>, vector<128x128xbf16>
    %cst = arith.constant dense<0.000000e+00> : vector<8x128xf32>
    %2 = tpu.matmul %0, %1, %cst {dimension_numbers = #tpu.dot_dimension_numbers<[1], [0], [0], [1], [0, 0, 1, 1], [], []>} : vector<8x128xbf16>, vector<128x128xbf16>, vector<8x128xf32> -> vector<8x128xf32>
    %c0_3 = arith.constant 0 : index
    %c0_4 = arith.constant 0 : index
    %3 = vector.load %arg4[%c0_3, %c0_4] : memref<1x128xf32, #tpu.memory_space<vmem>>, vector<1x128xf32>
    %4 = vector.broadcast %3 : vector<1x128xf32> to vector<8x128xf32>
    %5 = arith.addf %2, %4 : vector<8x128xf32>
    %c0_5 = arith.constant 0 : index
    %c0_6 = arith.constant 0 : index
    %6 = vector.load %arg5[%c0_5, %c0_6] : memref<8x128xf32, #tpu.memory_space<vmem>>, vector<8x128xf32>
    tpu.vector_store %arg5[%c0_5, %c0_6], %5 {strides = array<i32>} : memref<8x128xf32, #tpu.memory_space<vmem>>, vector<8x128xf32>,
    return
  }
  func.func @transform_0(%arg0: i32, %arg1: i32) -> (i32, i32) {
    %c0_i32 = arith.constant 0 : i32
    %c0_i32_0 = arith.constant 0 : i32
    return %arg0, %c0_i32 : i32, i32
  }
  func.func @transform_1(%arg0: i32, %arg1: i32) -> (i32, i32) {
    %c0_i32 = arith.constant 0 : i32
    %c0_i32_0 = arith.constant 0 : i32
    return %c0_i32, %arg1 : i32, i32
  }
  func.func @transform_2(%arg0: i32, %arg1: i32) -> (i32, i32) {
    %c0_i32 = arith.constant 0 : i32
    %c0_i32_0 = arith.constant 0 : i32
    return %c0_i32, %arg1 : i32, i32
  }
  func.func @transform_3(%arg0: i32, %arg1: i32) -> (i32, i32) {
    %c0_i32 = arith.constant 0 : i32
    return %arg0, %arg1 : i32, i32
  }
}

</mosaic_0001>

<bundles_post_ra>
// kernel: _forward_impl.1
= control target key start
LH: loop header
LB: loop body
LE: loop exit
PB: predicated region body
PF: predicated region fallthrough
CT: control target
= control target key end

     0   :  { %8 = vsyncpa [#allocation3], 0  ;;  %s292_s0 = inlined_call_operand.vmem [shape: bf16[8,128], index: 0, kind: input, shape index: {}]   ;;  %s293_s1 = inlined_call_operand.hbm [shape: bf16[128,128], index: 1, kind: input, shape index: {}]   ;;  %s294_s2 = inlined_call_operand.vmem [shape: f32[1,128], index: 2, kind: input, shape index: {}]   ;;  %s295_s3 = inlined_call_operand.hbm [shape: f32[8,128], index: 3, kind: output, shape index: {}]  }
   0x1   :  { %9 = vsyncpa [#allocation4], 0  ;;  %s254_s12 = smov [#allocation2]  }
   0x2   :  { %s17_s13 = sshll.u32 %s254_s12, 4  ;;  %s18_s13 = int_to_ptr.vmem [resolvable:$true] %s17_s13 }
   0x3   :  { %s218_s14 = scalar_lea.vmem %s18_s13, 1024  ;;  %p223_p1 = scmp.lt.s32.totalorder %s18_s13, %s18_s13 }
   0x4   :  { %p219_p0 = scmp.ne.s32.totalorder %s18_s13, %s218_s14  ;;  %p224_p2 = scmp.lt.s32.totalorder %s218_s14, %s218_s14 }
   0x6   :  { %p225_p3 = por %p224_p2, %p223_p1 }
   0x8   :  { %p226_p4 = pnand %p225_p3, %p219_p0 }
   0xa   :  { %229 = shalt.err (!%p226_p4)
}
   0xb   :  { %s255_s15 = smov 64   ;;  %s256_s16 = smov 4  }
   0xc   :  { %23 = dma.hbm_to_vmem [thread:$0]  %s293_s1, 1024, %s18_s13, [#allocation3], %s255_s15, %s255_s15, %s256_s16  }
   0xd   :  { %250 = dma.done.wait [#allocation3], 1024  }
   0xe   :  { %251 = vsyncadd [#allocation3], 4294966272  ;;  %v257_v0 = vmov 0.0   ;;  %vm258_vm0 = vmmov 0   ;;  %v202_v1 = vld [vmem:[#allocation2 + $0x38] sm:$0xff]   ;;  %v203_v2 = vld [vmem:[#allocation2 + $0x30] sm:$0xff]  }
   0xf   :  { %176 = vmatprep.subr.bf16.mxu0 %v257_v0  ;;  %192 = vmatprep.mubr.msk.bf16.mxu0 %vm258_vm0, %v257_v0  ;;  %v204_v3 = vld [vmem:[#allocation2 + $0x28] sm:$0xff]   ;;  %v205_v4 = vld [vmem:[#allocation2 + $0x20] sm:$0xff]   ;;  %v206_v5 = vld [vmem:[#allocation2 + $0x18] sm:$0xff]   ;;  %s259_s22 = smov [#allocation5]  }
  0x10   :  { %177 = vmatpush3.bf16.msra.mxu0 %v202_v1  ;;  %v207_v6 = vld [vmem:[#allocation2 + $0x10] sm:$0xff]   ;;  %v208_v7 = vld [vmem:[#allocation2 + $0x8] sm:$0xff]   ;;  %v209_v8 = vld [vmem:[#allocation2] sm:$0xff]   ;;  %s149_s23 = sshll.u32 %s259_s22, 4  ;;  %s150_s23 = int_to_ptr.vmem [resolvable:$true] %s149_s23 }
  0x11   :  { %178 = vmatprep.subr.bf16.mxu0 %v257_v0  ;;  %v30_v9 = vld [vmem:[%s292_s0] sm:$0xf]  ;;  %s230_s24 = scalar_lea.vmem %s150_s23, 128  ;;  %p235_p6 = scmp.lt.s32.totalorder %s150_s23, %s150_s23 }
  0x12   :  { %v158_v10 = vld [vmem:[%s294_s2] ss:$0 sm:$0xff]  ;;  %p231_p5 = scmp.ne.s32.totalorder %s150_s23, %s230_s24  ;;  %p236_p7 = scmp.lt.s32.totalorder %s230_s24, %s230_s24 }
  0x14   :  { %179 = vmatpush3.bf16.msra.mxu0 %v203_v2  ;;  %p237_p8 = por %p236_p7, %p235_p6 }
  0x15   :  { %180 = vmatprep.subr.bf16.mxu0 %v257_v0 }
  0x16   :  { %p238_p9 = pnand %p237_p8, %p231_p5 }
  0x18   :  { %181 = vmatpush3.bf16.msra.mxu0 %v204_v3 }
  0x19   :  { %182 = vmatprep.subr.bf16.mxu0 %v257_v0 }
  0x1c   :  { %183 = vmatpush3.bf16.msra.mxu0 %v205_v4 }
  0x1d   :  { %184 = vmatprep.subr.bf16.mxu0 %v257_v0 }
  0x20   :  { %185 = vmatpush3.bf16.msra.mxu0 %v206_v5 }
  0x21   :  { %186 = vmatprep.subr.bf16.mxu0 %v257_v0 }
  0x24   :  { %187 = vmatpush3.bf16.msra.mxu0 %v207_v6 }
  0x25   :  { %188 = vmatprep.subr.bf16.mxu0 %v257_v0 }
  0x28   :  { %189 = vmatpush3.bf16.msra.mxu0 %v208_v7 }
  0x29   :  { %190 = vmatprep.subr.bf16.mxu0 %v257_v0 }
  0x2c   :  { %191 = vmatpush3.bf16.msra.mxu0 %v209_v8 }
  0x2f   :  { %193 = vmatmul.mubr.bf16.vlgmr.msra.gmra.mxu0 %v30_v9 }
  0xef   :  { %v136_v11 = vpop.f32.mrf.mxu0 }
  0xf0   :  { %v137_v12 = vadd.f32 %v158_v10, %v136_v11 }
  0xf1   :  { %v194_v13 = vpop.f32.mrf.mxu0 }
  0xf2   :  { %142 = vst [vmem:[#allocation5] sm:$0xff] %v137_v12 }
  0xf3   :  { %v139_v14 = vpop.f32.mrf.mxu0 }
  0xf4   :  { %241 = shalt.err (!%p238_p9)
}
  0xf5   :  { %152 = dma.vmem_to_hbm [thread:$0]  %s150_s23, 128, %s295_s3, [#allocation4]   ;;  %v195_v15 = vpop.f32.mrf.mxu0 }
  0xf6   :  { %252 = dma.done.wait [#allocation4], 128  }
  0xf7   :  { %253 = vsyncadd [#allocation4], 4294967168 }
  0xf8   :  { %156 = vsyncpa [#allocation3], 1 }
  0xf9   :  { %157 = vsyncpa [#allocation4], 1 }

</bundles_post_ra>
